<compile_context>
chip_gen: v7x
topology: tpu7x:2x2x1
jax: 0.10.0
libtpu: 0.0.40
codegen_flags: <defaults>
</compile_context>

<pallas_src>
import functools

import jax
import jax.numpy as jnp
from jax.experimental import pallas as pl
from jax.experimental.pallas import tpu as pltpu

_LANES = 128                       # lane width; all logical dims must fit in it
_ROW_W1 = 0 * _LANES               # state_encoder layer 1 weight (F x H)
_ROW_W2 = 1 * _LANES               # state_encoder layer 2 weight (H x S)
_ROW_WH1 = 2 * _LANES              # fused head layer 1 weight   (S x 2H) = [wa1 | wv1]
_ROW_WH2 = 3 * _LANES              # fused head layer 2 weight   (2H x A+1) block-diag
_ROW_B1 = 4 * _LANES               # biases, each on its own 8-aligned row
_ROW_B2 = _ROW_B1 + 8
_ROW_BH1 = _ROW_B2 + 8
_ROW_BH2 = _ROW_BH1 + 8
_P_ROWS = _ROW_BH2 + 8             # = 544 rows total


# ----------------------------- Pallas kernel ------------------------------ #
def _agent_forward_kernel(x_ref, p_ref, out_ref, *, F, H, S):
    # x_ref:   (TILE_B, F)   encoded state features (no lane padding)
    # p_ref:   (544, 128)    packed, zero-padded parameter slab
    # out_ref: (TILE_B, 128) lane-dense output; lanes [0,A)=logits, lane A=value
    x = x_ref[...]

    # Static ref slices at the true contraction sizes (all row offsets/counts
    # are multiples of 8, so loads stay sublane-aligned; padded lanes are zero).
    w1 = p_ref[_ROW_W1:_ROW_W1 + F, :]          # (F, 128), cols [0,H) used
    w2 = p_ref[_ROW_W2:_ROW_W2 + H, :]          # (H, 128), cols [0,S) used
    wh1 = p_ref[_ROW_WH1:_ROW_WH1 + S, :]       # (S, 128), cols [0,2H) used
    wh2 = p_ref[_ROW_WH2:_ROW_WH2 + 2 * H, :]   # (2H, 128), cols [0,A+1) used
    b1 = p_ref[_ROW_B1:_ROW_B1 + 1, :]
    b2 = p_ref[_ROW_B2:_ROW_B2 + 1, :]
    bh1 = p_ref[_ROW_BH1:_ROW_BH1 + 1, :]
    bh2 = p_ref[_ROW_BH2:_ROW_BH2 + 1, :]

    # state_encoder: Linear -> ReLU -> Linear   (zero padding stays zero)
    h = jnp.maximum(jnp.dot(x, w1, preferred_element_type=jnp.float32) + b1, 0.0)
    s = jnp.dot(h[:, :H], w2, preferred_element_type=jnp.float32) + b2

    # fused action_head + value_head layer 1: Linear -> ReLU
    h2 = jnp.maximum(
        jnp.dot(s[:, :S], wh1, preferred_element_type=jnp.float32) + bh1, 0.0)

    # fused layer 2 (block-diagonal): lanes [0,A) = action logits, lane A = value
    out_ref[...] = (
        jnp.dot(h2[:, :2 * H], wh2, preferred_element_type=jnp.float32) + bh2)


# ------------------------------ param packing ------------------------------ #
def pack_params(params, feature_dim, hidden_dim, state_dim, action_dim):
    """Pack all weights/biases into one lane-padded (544, 128) f32 slab."""
    F, H, S, A = feature_dim, hidden_dim, state_dim, action_dim
    assert F <= _LANES and H <= _LANES and S <= _LANES
    assert 2 * H <= _LANES and A + 1 <= _LANES
    slab = jnp.zeros((_P_ROWS, _LANES), jnp.float32)
    # state_encoder
    slab = slab.at[_ROW_W1:_ROW_W1 + F, :H].set(params["w1"])
    slab = slab.at[_ROW_W2:_ROW_W2 + H, :S].set(params["w2"])
    # fused head layer 1: [wa1 | wv1]
    slab = slab.at[_ROW_WH1:_ROW_WH1 + S, :H].set(params["wa1"])
    slab = slab.at[_ROW_WH1:_ROW_WH1 + S, H:2 * H].set(params["wv1"])
    # fused head layer 2: block-diagonal [[wa2, 0], [0, wv2]]
    slab = slab.at[_ROW_WH2:_ROW_WH2 + H, :A].set(params["wa2"])
    slab = slab.at[_ROW_WH2 + H:_ROW_WH2 + 2 * H, A:A + 1].set(params["wv2"])
    # biases
    slab = slab.at[_ROW_B1:_ROW_B1 + 1, :H].set(params["b1"])
    slab = slab.at[_ROW_B2:_ROW_B2 + 1, :S].set(params["b2"])
    slab = slab.at[_ROW_BH1:_ROW_BH1 + 1, :H].set(params["ba1"])
    slab = slab.at[_ROW_BH1:_ROW_BH1 + 1, H:2 * H].set(params["bv1"])
    slab = slab.at[_ROW_BH2:_ROW_BH2 + 1, :A].set(params["ba2"])
    slab = slab.at[_ROW_BH2:_ROW_BH2 + 1, A:A + 1].set(params["bv2"])
    return slab


# ------------------------------ tile selection ------------------------------ #
def _choose_tiling(batch, max_tile=1024):
    """Pick (tile_b, pad_b): tiles up to max_tile rows, >= 2 grid steps when the
    batch allows (keeps the "parallel" axis useful on v7x's 2 TensorCores)."""
    pad128 = max(_LANES, ((batch + _LANES - 1) // _LANES) * _LANES)
    if pad128 == _LANES:
        return _LANES, _LANES
    tile = min(max_tile, (pad128 // 2) // _LANES * _LANES)
    tile = max(tile, _LANES)
    pad_b = ((batch + tile - 1) // tile) * tile
    return tile, pad_b


# --------------------------------- wrapper --------------------------------- #
def agent_forward(x, packed_params, *, hidden_dim, state_dim, action_dim,
                  max_tile=1024):
    """Batched forward through state_encoder + action_head + value_head.

    x: (B, feature_dim) float32 encoded state features.
    packed_params: (544, 128) slab from pack_params.
    Returns (action_logits (B, action_dim), value (B, 1)).
    """
    B, F = x.shape
    tile_b, pad_b = _choose_tiling(B, max_tile)
    xf = x.astype(jnp.float32)
    # Only pad along batch (rows); features stay at their true width F.
    xp = xf if pad_b == B else jnp.zeros((pad_b, F), jnp.float32).at[:B, :].set(xf)

    kernel = functools.partial(_agent_forward_kernel, F=F, H=hidden_dim, S=state_dim)

    # Advisory cost estimate so XLA schedules the surrounding glue sensibly.
    flops = 2 * pad_b * _LANES * (F + hidden_dim + state_dim + 2 * hidden_dim)
    bytes_accessed = 4 * (pad_b * (F + _LANES) + _P_ROWS * _LANES)

    out = pl.pallas_call(
        kernel,
        out_shape=jax.ShapeDtypeStruct((pad_b, _LANES), jnp.float32),
        grid=(pad_b // tile_b,),
        in_specs=[
            # batch tile, last dim == full array dim (no lane padding needed)
            pl.BlockSpec((tile_b, F), lambda i: (i, 0)),
            # grid-invariant parameter slab (fetched once; 272 KiB, negligible)
            pl.BlockSpec((_P_ROWS, _LANES), lambda i: (0, 0)),
        ],
        out_specs=pl.BlockSpec((tile_b, _LANES), lambda i: (i, 0)),
        compiler_params=pltpu.CompilerParams(
            dimension_semantics=("parallel",)),                 # megacore sharding
        cost_estimate=pl.CostEstimate(
            flops=flops, transcendentals=0, bytes_accessed=bytes_accessed),
    )(xp, packed_params)

    logits = out[:B, :action_dim]
    value = out[:B, action_dim:action_dim + 1]
    return logits, value


# --------------------------- plain-JAX glue code --------------------------- #
def _l2_normalize(v, eps=1e-12):
    # Matches F.normalize(v.unsqueeze(0), dim=1).squeeze(0)
    norm = jnp.sqrt(jnp.sum(v * v))
    return v / jnp.maximum(norm, eps)


def encode_state_features(node_features, partition_sizes, partition_densities,
                          global_metrics, local_metrics, feature_dim):
    """Reproduce BaseAgent.encode_state preprocessing (mean, normalize, concat, pad)."""
    if node_features.ndim > 1:
        node_features = node_features.mean(axis=0)
    ps = _l2_normalize(partition_sizes.astype(jnp.float32))
    pd = _l2_normalize(partition_densities.astype(jnp.float32))
    feats = [node_features.astype(jnp.float32), ps, pd,
             global_metrics.astype(jnp.float32)]
    if local_metrics is not None:
        feats.append(local_metrics.astype(jnp.float32))
    sf = jnp.concatenate(feats)
    actual = sf.shape[0]
    if actual < feature_dim:
        sf = jnp.concatenate([sf, jnp.zeros((feature_dim - actual,), jnp.float32)])
    elif actual > feature_dim:
        sf = sf[:feature_dim]
    return sf  # (feature_dim,)


def _linear_init(key, fan_in, fan_out):
    # PyTorch nn.Linear default: U(-1/sqrt(fan_in), 1/sqrt(fan_in))
    kw, kb = jax.random.split(key)
    bound = 1.0 / jnp.sqrt(jnp.float32(fan_in))
    w = jax.random.uniform(kw, (fan_in, fan_out), jnp.float32, -bound, bound)
    b = jax.random.uniform(kb, (1, fan_out), jnp.float32, -bound, bound)
    return w, b


def _init_params(key, feature_dim, hidden_dim, state_dim, action_dim):
    keys = jax.random.split(key, 6)
    w1, b1 = _linear_init(keys[0], feature_dim, hidden_dim)
    w2, b2 = _linear_init(keys[1], hidden_dim, state_dim)
    wa1, ba1 = _linear_init(keys[2], state_dim, hidden_dim)
    wa2, ba2 = _linear_init(keys[3], hidden_dim, action_dim)
    wv1, bv1 = _linear_init(keys[4], state_dim, hidden_dim)
    wv2, bv2 = _linear_init(keys[5], hidden_dim, 1)
    return dict(w1=w1, b1=b1, w2=w2, b2=b2,
                wa1=wa1, ba1=ba1, wa2=wa2, ba2=ba2,
                wv1=wv1, bv1=bv1, wv2=wv2, bv2=bv2)


# -------------------------------- reference -------------------------------- #
def _forward_ref(x, p):
    hp = jax.lax.Precision.HIGHEST

    def lin(v, w, b):
        return jnp.dot(v, w, precision=hp) + b

    h = jnp.maximum(lin(x, p["w1"], p["b1"]), 0.0)
    s = lin(h, p["w2"], p["b2"])
    logits = lin(jnp.maximum(lin(s, p["wa1"], p["ba1"]), 0.0), p["wa2"], p["ba2"])
    value = lin(jnp.maximum(lin(s, p["wv1"], p["bv1"]), 0.0), p["wv2"], p["bv2"])
    return logits, value


if __name__ == "__main__":
    # Small config consistent with the module's forward.
    feature_dim, hidden_dim, state_dim, action_dim = 32, 32, 16, 8
    batch, num_nodes, node_feat_dim, num_partitions = 256, 8, 4, 4

    key = jax.random.PRNGKey(0)
    k_nf, k_ps, k_pd, k_gm, k_lm, k_param = jax.random.split(key, 6)

    # Synthetic batch of AgentStates (graph side is non-tensor bookkeeping).
    node_features = jax.random.normal(k_nf, (batch, num_nodes, node_feat_dim), jnp.float32)
    partition_sizes = jax.random.uniform(k_ps, (batch, num_partitions), jnp.float32, 1.0, 5.0)
    partition_densities = jax.random.uniform(k_pd, (batch, num_partitions), jnp.float32)
    global_metrics = jax.random.uniform(k_gm, (batch, 3), jnp.float32)   # balance, cut, conductance
    local_metrics = jax.random.uniform(k_lm, (batch, 3), jnp.float32)    # degree, avg_nbr_deg, clustering
    # TODO(synk): graph-structural metric computation (_calculate_local_metrics,
    # cut_size/conductance/balance) is host-side Python over graph objects, not kernel work.

    encode = jax.vmap(functools.partial(encode_state_features, feature_dim=feature_dim))
    x = encode(node_features, partition_sizes, partition_densities,
               global_metrics, local_metrics)                            # (batch, feature_dim)

    params = _init_params(k_param, feature_dim, hidden_dim, state_dim, action_dim)
    packed = pack_params(params, feature_dim, hidden_dim, state_dim, action_dim)

    fwd = jax.jit(functools.partial(agent_forward, hidden_dim=hidden_dim,
                                    state_dim=state_dim, action_dim=action_dim))
    action_logits, value = fwd(x, packed)
    jax.block_until_ready((action_logits, value))

    # Correctness check against a pure-JAX reference.
    ref_logits, ref_value = _forward_ref(x, params)
    assert action_logits.shape == (batch, action_dim)
    assert value.shape == (batch, 1)
    assert jnp.allclose(action_logits, ref_logits, atol=5e-4, rtol=5e-4)
    assert jnp.allclose(value, ref_value, atol=5e-4, rtol=5e-4)

    print("KERNEL_OK")
</pallas_src>

<mosaic_0001>
module attributes {stable_mosaic.version = 11 : i64} {
  func.func @_agent_forward_kernel(%arg0: i32, %arg1: memref<128x32xf32, #tpu.memory_space<vmem>>, %arg2: memref<544x128xf32, #tpu.memory_space<vmem>>, %arg3: memref<128x128xf32, #tpu.memory_space<vmem>>) attributes {dimension_semantics = [#tpu.dimension_semantics<parallel>], iteration_bounds = array<i64: 2>, scalar_prefetch = 0 : i64, scratch_operands = 0 : i64, tpu.core_type = #tpu.core_type<tc>, window_params = [{transform_indices = @transform_0, window_bounds = array<i64: 128, 32>}, {pipeline_mode = #tpu.pipeline_mode<synchronous>, transform_indices = @transform_1, window_bounds = array<i64: 544, 128>}, {transform_indices = @transform_2, window_bounds = array<i64: 128, 128>}]} {
    %c0 = arith.constant 0 : index
    %c0_0 = arith.constant 0 : index
    %0 = vector.load %arg1[%c0, %c0_0] : memref<128x32xf32, #tpu.memory_space<vmem>>, vector<128x32xf32>
    %c0_1 = arith.constant 0 : index
    %c0_2 = arith.constant 0 : index
    %1 = vector.load %arg2[%c0_1, %c0_2] : memref<544x128xf32, #tpu.memory_space<vmem>>, vector<32x128xf32>
    %c128 = arith.constant 128 : index
    %c0_3 = arith.constant 0 : index
    %2 = vector.load %arg2[%c128, %c0_3] : memref<544x128xf32, #tpu.memory_space<vmem>>, vector<32x128xf32>
    %c256 = arith.constant 256 : index
    %c0_4 = arith.constant 0 : index
    %3 = vector.load %arg2[%c256, %c0_4] : memref<544x128xf32, #tpu.memory_space<vmem>>, vector<16x128xf32>
    %c384 = arith.constant 384 : index
    %c0_5 = arith.constant 0 : index
    %4 = vector.load %arg2[%c384, %c0_5] : memref<544x128xf32, #tpu.memory_space<vmem>>, vector<64x128xf32>
    %c512 = arith.constant 512 : index
    %c0_6 = arith.constant 0 : index
    %5 = vector.load %arg2[%c512, %c0_6] : memref<544x128xf32, #tpu.memory_space<vmem>>, vector<1x128xf32>
    %c520 = arith.constant 520 : index
    %c0_7 = arith.constant 0 : index
    %6 = vector.load %arg2[%c520, %c0_7] : memref<544x128xf32, #tpu.memory_space<vmem>>, vector<1x128xf32>
    %c528 = arith.constant 528 : index
    %c0_8 = arith.constant 0 : index
    %7 = vector.load %arg2[%c528, %c0_8] : memref<544x128xf32, #tpu.memory_space<vmem>>, vector<1x128xf32>
    %c536 = arith.constant 536 : index
    %c0_9 = arith.constant 0 : index
    %8 = vector.load %arg2[%c536, %c0_9] : memref<544x128xf32, #tpu.memory_space<vmem>>, vector<1x128xf32>
    %cst = arith.constant dense<0.000000e+00> : vector<128x128xf32>
    %9 = tpu.matmul %0, %1, %cst {dimension_numbers = #tpu.dot_dimension_numbers<[1], [0], [0], [1], [0, 0, 1, 1], [], []>} : vector<128x32xf32>, vector<32x128xf32>, vector<128x128xf32> -> vector<128x128xf32>
    %10 = vector.broadcast %5 : vector<1x128xf32> to vector<128x128xf32>
    %11 = arith.addf %9, %10 : vector<128x128xf32>
    %cst_10 = arith.constant 0.000000e+00 : f32
    %12 = vector.broadcast %cst_10 : f32 to vector<128x128xf32>
    %13 = arith.maximumf %11, %12 : vector<128x128xf32>
    %14 = vector.extract_strided_slice %13 {offsets = [0, 0], sizes = [128, 32], strides = [1, 1]} : vector<128x128xf32> to vector<128x32xf32>
    %cst_11 = arith.constant dense<0.000000e+00> : vector<128x128xf32>
    %15 = tpu.matmul %14, %2, %cst_11 {dimension_numbers = #tpu.dot_dimension_numbers<[1], [0], [0], [1], [0, 0, 1, 1], [], []>} : vector<128x32xf32>, vector<32x128xf32>, vector<128x128xf32> -> vector<128x128xf32>
    %16 = vector.broadcast %6 : vector<1x128xf32> to vector<128x128xf32>
    %17 = arith.addf %15, %16 : vector<128x128xf32>
    %18 = vector.extract_strided_slice %17 {offsets = [0, 0], sizes = [128, 16], strides = [1, 1]} : vector<128x128xf32> to vector<128x16xf32>
    %cst_12 = arith.constant dense<0.000000e+00> : vector<128x128xf32>
    %19 = tpu.matmul %18, %3, %cst_12 {dimension_numbers = #tpu.dot_dimension_numbers<[1], [0], [0], [1], [0, 0, 1, 1], [], []>} : vector<128x16xf32>, vector<16x128xf32>, vector<128x128xf32> -> vector<128x128xf32>
    %20 = vector.broadcast %7 : vector<1x128xf32> to vector<128x128xf32>
    %21 = arith.addf %19, %20 : vector<128x128xf32>
    %cst_13 = arith.constant 0.000000e+00 : f32
    %22 = vector.broadcast %cst_13 : f32 to vector<128x128xf32>
    %23 = arith.maximumf %21, %22 : vector<128x128xf32>
    %24 = vector.extract_strided_slice %23 {offsets = [0, 0], sizes = [128, 64], strides = [1, 1]} : vector<128x128xf32> to vector<128x64xf32>
    %cst_14 = arith.constant dense<0.000000e+00> : vector<128x128xf32>
    %25 = tpu.matmul %24, %4, %cst_14 {dimension_numbers = #tpu.dot_dimension_numbers<[1], [0], [0], [1], [0, 0, 1, 1], [], []>} : vector<128x64xf32>, vector<64x128xf32>, vector<128x128xf32> -> vector<128x128xf32>
    %26 = vector.broadcast %8 : vector<1x128xf32> to vector<128x128xf32>
    %27 = arith.addf %25, %26 : vector<128x128xf32>
    %c0_15 = arith.constant 0 : index
    %c0_16 = arith.constant 0 : index
    %28 = vector.load %arg3[%c0_15, %c0_16] : memref<128x128xf32, #tpu.memory_space<vmem>>, vector<128x128xf32>
    tpu.vector_store %arg3[%c0_15, %c0_16], %27 {strides = array<i32>} : memref<128x128xf32, #tpu.memory_space<vmem>>, vector<128x128xf32>,
    return
  }
  func.func @transform_0(%arg0: i32) -> (i32, i32) {
    %c0_i32 = arith.constant 0 : i32
    %c0_i32_0 = arith.constant 0 : i32
    return %arg0, %c0_i32 : i32, i32
  }
  func.func @transform_1(%arg0: i32) -> (i32, i32) {
    %c0_i32 = arith.constant 0 : i32
    %c0_i32_0 = arith.constant 0 : i32
    %c0_i32_1 = arith.constant 0 : i32
    return %c0_i32, %c0_i32_0 : i32, i32
  }
  func.func @transform_2(%arg0: i32) -> (i32, i32) {
    %c0_i32 = arith.constant 0 : i32
    %c0_i32_0 = arith.constant 0 : i32
    return %arg0, %c0_i32 : i32, i32
  }
}

</mosaic_0001>

<bundles_post_ra>
// kernel: agent_forward.1
= control target key start
LH: loop header
LB: loop body
LE: loop exit
PB: predicated region body
PF: predicated region fallthrough
CT: control target
= control target key end

     0   :  { %7 = vsyncpa [#allocation3], 0  ;;  %s1517_s9 = smov 0   ;;  %s1683_s0 = inlined_call_operand.vmem [shape: f32[256,32], index: 0, kind: input, shape index: {}]   ;;  %s1684_s1 = inlined_call_operand.hbm [shape: f32[544,128], index: 1, kind: input, shape index: {}]   ;;  %s1685_s2 = inlined_call_operand.vmem [shape: f32[256,128], index: 2, kind: output, shape index: {}]  }
   0x1 LB: > { %s1107_s10 = sadd.s32 4294967295, %s1497_s9   ;;  %p1109_p0 = scmp.ge.s32.totalorder %s1497_s9, 1  ;;  %s1497_s9 = sphi %s1517_s9, %s13_s9  }
   0x2   : > { %p91_p1 = scmp.lt.s32.totalorder %s1497_s9, 3  ;;  %s1499_s11 = smov [#allocation2]  }
   0x3   : > { %s103_s12 = sshll.u32 %s1499_s11, 4  ;;  %p1531_p3 = scmp.eq.s32.totalorder %s1107_s10, 0  ;;  %s104_s12 = int_to_ptr.vmem [resolvable:$true] %s103_s12 }
   0x4   : > { %p1525_p2 = pnand %p1109_p0, %p91_p1  ;;  %s1459_s18 = scalar_lea.hbm %s1684_s1, 8704 }
   0x5   : > { %s1690_s14 = scalar_select %p1531_p3, 1, 0 }
   0x6   : > { %s1689_s13 = scalar_select %p1525_p2, 1, 0 }
   0x7   : > { %p1442_p4 = pneg %p1525_p2  ;;  %p1460_p6 = scmp.ne.s32.totalorder %s1684_s1, %s1459_s18 }
   0x8   : > { %p1466_p10 = scmp.lt.u32.totalorder %s1459_s18, %s1684_s1 }
   0x9   : > { %p1539_p5 = pnand %p1531_p3, %p1442_p4 }
   0xb   : > { %p1461_p7 = pneg %p1539_p5 }
   0xd   : > { %p1462_p8 = pnand %p1461_p7, %p1460_p6 }
   0xf   : > { %p1463_p9 = pneg %p1462_p8 }
  0x11   : > { %p1468_p11 = pnand %p1466_p10, %p1463_p9 }
  0x13   : > { %1471 = shalt.err (!%p1468_p11)
}
  0x14   : > { %s1472_s23 = scalar_lea.vmem %s104_s12, 8704  ;;  %p1480_p1 = scmp.lt.s32.totalorder %s104_s12, %s104_s12 }
  0x15   : > { %p1473_p12 = scmp.ne.s32.totalorder %s104_s12, %s1472_s23  ;;  %p1481_p4 = scmp.lt.s32.totalorder %s1472_s23, %s1472_s23 }
  0x17   : > { %p1475_p13 = pnand %p1473_p12, %p1461_p7  ;;  %p1482_p3 = por %p1481_p4, %p1480_p1 }
  0x19   : > { %p1476_p0 = pneg %p1475_p13 }
  0x1b   : > { %p1483_p2 = pnand %p1482_p3, %p1476_p0 }
  0x1d   : > { %1486 = shalt.err (!%p1483_p2)
}
  0x1e   : > { %s1500_s24 = smov 128   ;;  %s1501_s25 = smov 8  }
  0x1f   : > { %1445 = dma.hbm_to_vmem [thread:$0]  (!%p1539_p5), %s1684_s1, 8704, %s104_s12, [#allocation3], %s1500_s24, %s1500_s24, %s1501_s25  }
  0x20   : > { %p1692_p6 = scmp.ne.s32.totalorder %s1689_s13, 0 }
  0x21   : > { %p1693_p8 = scmp.ne.s32.totalorder (!%p1692_p6), %s1690_s14, 0 }
  0x22   : > { %128 = sbr.rel (%p1692_p6) target bundleno = 949 (0x3b5), region = 28 }
  0x29   : > { %1492 = dma.done.wait (%p1693_p8), [#allocation3], 8704  }
  0x2a   : > { %1494 = vsyncadd (%p1693_p8), [#allocation3], 4294958592  ;;  %s1114_s28 = sshll.u32 %s1107_s10, 4  ;;  %vm204_vm0 = vcmask 261120   ;;  %v178_v0 = vld [vmem:[#allocation2] sm:$0xff]  ;;  %v179_v1 = vld [vmem:[#allocation2 + $0x8] sm:$0xff] }
  0x2b   : > { %p151_p2 = scmp.lt.s32.totalorder %s1114_s28, 31  ;;  %v180_v2 = vld [vmem:[#allocation2 + $0x10] sm:$0xff]  ;;  %v1402_v3 = vpack.c.bf16 %v179_v1, %v178_v0  ;;  %v181_v4 = vld [vmem:[#allocation2 + $0x18] sm:$0xff]  ;;  %v182_v7 = vld [vmem:[#allocation2 + $0x80] sm:$0xff]  ;;  %vm615_vm1 = vcmask 130048   ;;  %vm829_vm2 = vcmask 523264  }
  0x2c   : > { %v1406_v6 = vpack.c.bf16 %v181_v4, %v180_v2  ;;  %v183_v8 = vld [vmem:[#allocation2 + $0x88] sm:$0xff]  ;;  %v184_v25 = vld [vmem:[#allocation2 + $0x90] sm:$0xff]  ;;  %v185_v26 = vld [vmem:[#allocation2 + $0x98] sm:$0xff] }
  0x2d   : > { %s1695_s28 = smov (!%p151_p2, %s1114_s28), 31  ;;  %1403 = vmatprep.subr.bf16.mxu0 %v1402_v3  ;;  %v1410_v10 = vpack.c.bf16 %v183_v8, %v182_v7  ;;  %v1414_v27 = vpack.c.bf16 %v185_v26, %v184_v25  ;;  %v186_v28 = vld [vmem:[#allocation2 + $0x100] sm:$0xff]  ;;  %v187_v29 = vld [vmem:[#allocation2 + $0x108] sm:$0xff]  ;;  %v194_v25 = vld [vmem:[#allocation2 + $0x1b0] sm:$0xff] }
  0x2e   : > { %s1115_s29 = sshll.u32 %s1695_s28, 3  ;;  %1405 = vmatpush3.bf16.msra.mxu0 %v1402_v3  ;;  %v1418_v30 = vpack.c.bf16 %v187_v29, %v186_v28  ;;  %v1118_v31 = vld [vmem:[#allocation2 + $0x200] ss:$0 sm:$0xff]  ;;  %v195_v26 = vld [vmem:[#allocation2 + $0x1b8] sm:$0xff]  ;;  %v1135_v28 = vld [vmem:[#allocation2 + $0x208] ss:$0 sm:$0xff] }
  0x2f   : > { %s1575_s4 = scalar_lea.vmem %s1683_s0, %s1115_s29  ;;  %1407 = vmatprep.subr.bf16.mxu0 %v1406_v6  ;;  %1411 = vmatprep.subr.bf16.mxu1 %v1410_v10  ;;  %s1662_s7 = scalar_lea.vmem %s1685_s2, %s1115_s29 }
  0x30   : > { %v162_v5 = vld [vmem:[%s1575_s4] sm:$0xff]  ;;  %v163_v9 = vld [vmem:[%s1575_s4 + $0x8] sm:$0xff]  ;;  %v164_v11 = vld [vmem:[%s1575_s4 + $0x10] sm:$0xff]  ;;  %1413 = vmatpush3.bf16.msra.mxu1 %v1410_v10 }
  0x31   : > { %1278 = vmatprep.mubr.msk.f32.mxu0 %vm204_vm0, %v162_v5  ;;  %v165_v12 = vld [vmem:[%s1575_s4 + $0x18] sm:$0xff]  ;;  %v166_v13 = vld [vmem:[%s1575_s4 + $0x20] sm:$0xff]  ;;  %v167_v14 = vld [vmem:[%s1575_s4 + $0x28] sm:$0xff]  ;;  %1415 = vmatprep.subr.bf16.mxu1 %v1414_v27 }
  0x32   : > { %1409 = vmatpush3.bf16.msra.mxu0 %v1406_v6  ;;  %v168_v15 = vld [vmem:[%s1575_s4 + $0x30] sm:$0xff]  ;;  %v169_v16 = vld [vmem:[%s1575_s4 + $0x38] sm:$0xff]  ;;  %v170_v17 = vld [vmem:[%s1575_s4 + $0x40] sm:$0xff] }
  0x33   : > { %v171_v18 = vld [vmem:[%s1575_s4 + $0x48] sm:$0xff]  ;;  %v172_v19 = vld [vmem:[%s1575_s4 + $0x50] sm:$0xff]  ;;  %v173_v20 = vld [vmem:[%s1575_s4 + $0x58] sm:$0xff]  ;;  %1419 = vmatprep.subr.bf16.mxu0 %v1418_v30 }
  0x34   : > { %v174_v21 = vld [vmem:[%s1575_s4 + $0x60] sm:$0xff]  ;;  %v175_v22 = vld [vmem:[%s1575_s4 + $0x68] sm:$0xff]  ;;  %v176_v23 = vld [vmem:[%s1575_s4 + $0x70] sm:$0xff]  ;;  %1417 = vmatpush3.bf16.msra.mxu1 %v1414_v27  ;;  %v1434_v27 = vpack.c.bf16 %v195_v26, %v194_v25 }
  0x35   : > { %1279 = vmatmul.mubr.msk.f32.vlgmr.msra.gmra.mrb[0].mxu0 %vm204_vm0, %v163_v9  ;;  %v177_v24 = vld [vmem:[%s1575_s4 + $0x78] sm:$0xff] }
  0x36   : > { %1281 = vmatprep.mubr.msk.f32.mxu0 %vm204_vm0, %v164_v11  ;;  %1421 = vmatpush3.bf16.msra.mxu0 %v1418_v30 }
  0x39   : > { %1282 = vmatmul.mubr.msk.f32.gmra.mrb[2].mxu0 %vm204_vm0, %v165_v12 }
  0x3a   : > { %1284 = vmatprep.mubr.msk.f32.mxu0 %vm204_vm0, %v166_v13 }
  0x3d   : > { %1285 = vmatmul.mubr.msk.f32.gmra.mrb[4].mxu0 %vm204_vm0, %v167_v14 }
  0x3e   : > { %1287 = vmatprep.mubr.msk.f32.mxu0 %vm204_vm0, %v168_v15 }
  0x41   : > { %1288 = vmatmul.mubr.msk.f32.gmra.mrb[6].mxu0 %vm204_vm0, %v169_v16  ;;  %v188_v16 = vld [vmem:[#allocation2 + $0x180] sm:$0xff] }
  0x42   : > { %1290 = vmatprep.mubr.msk.f32.mxu0 %vm204_vm0, %v170_v17  ;;  %v189_v17 = vld [vmem:[#allocation2 + $0x188] sm:$0xff] }
  0x45   : > { %1291 = vmatmul.mubr.msk.f32.gmra.mrb[8].mxu0 %vm204_vm0, %v171_v18  ;;  %v190_v18 = vld [vmem:[#allocation2 + $0x190] sm:$0xff] }
  0x46   : > { %1293 = vmatprep.mubr.msk.f32.mxu0 %vm204_vm0, %v172_v19  ;;  %v1422_v19 = vpack.c.bf16 %v189_v17, %v188_v16 }
  0x48   : > { %1423 = vmatprep.subr.bf16.mxu1 %v1422_v19 }
  0x49   : > { %1294 = vmatmul.mubr.msk.f32.gmra.mrb[10].mxu0 %vm204_vm0, %v173_v20  ;;  %v191_v20 = vld [vmem:[#allocation2 + $0x198] sm:$0xff] }
  0x4a   : > { %1296 = vmatprep.mubr.msk.f32.mxu0 %vm204_vm0, %v174_v21  ;;  %v1426_v21 = vpack.c.bf16 %v191_v20, %v190_v18 }
  0x4d   : > { %1297 = vmatmul.mubr.msk.f32.gmra.mrb[12].mxu0 %vm204_vm0, %v175_v22  ;;  %v192_v22 = vld [vmem:[#allocation2 + $0x1a0] sm:$0xff] }
  0x4e   : > { %1299 = vmatprep.mubr.msk.f32.mxu0 %vm204_vm0, %v176_v23  ;;  %v193_v23 = vld [vmem:[#allocation2 + $0x1a8] sm:$0xff] }
  0x51   : > { %1300 = vmatmul.mubr.msk.f32.gmra.mrb[14].mxu0 %vm204_vm0, %v177_v24  ;;  %v1430_v24 = vpack.c.bf16 %v193_v23, %v192_v22 }
 0x108   : > { %v1280_v32 = vpop.f32.mrb[0].mxu0 }
 0x109   : > { %v325_v33 = vadd.f32 %v1280_v32, %v1118_v31  ;;  %v319_v34 = vpop.f32.mrb[1].mxu0 }
 0x10a   : > { %v320_v35 = vadd.f32 %v1118_v31, %v319_v34 }
 0x10b   : > { %v399_v38 = vmax.f32 %v325_v33, 0.0 }
 0x10c   : > { %v398_v36 = vmax.f32 %v320_v35, 0.0  ;;  %v1283_v37 = vpop.f32.mrb[2].mxu0 }
 0x10d   : > { %v335_v39 = vadd.f32 %v1283_v37, %v1118_v31  ;;  %v329_v40 = vpop.f32.mrb[3].mxu0 }
 0x10e   : > { %v330_v41 = vadd.f32 %v1118_v31, %v329_v40  ;;  %1310 = vmatprep.mubr.msk.f32.mxu1 %vm204_vm0, %v398_v36 }
 0x10f   : > { %1311 = vmatmul.mubr.msk.f32.vlgmr.msra.gmra.mrb[0].mxu1 %vm204_vm0, %v399_v38  ;;  %v401_v44 = vmax.f32 %v335_v39, 0.0 }
 0x110   : > { %v400_v42 = vmax.f32 %v330_v41, 0.0  ;;  %v1286_v43 = vpop.f32.mrb[4].mxu0  ;;  %1425 = vmatpush3.bf16.msra.mxu1 %v1422_v19 }
 0x111   : > { %v345_v45 = vadd.f32 %v1286_v43, %v1118_v31  ;;  %v339_v46 = vpop.f32.mrb[5].mxu0  ;;  %1427 = vmatprep.subr.bf16.mxu1 %v1426_v21 }
 0x112   : > { %v340_v47 = vadd.f32 %v1118_v31, %v339_v46  ;;  %1313 = vmatprep.mubr.msk.f32.mxu1 %vm204_vm0, %v400_v42 }
 0x113   : > { %1314 = vmatmul.mubr.msk.f32.gmra.mrb[2].mxu1 %vm204_vm0, %v401_v44  ;;  %v403_v50 = vmax.f32 %v345_v45, 0.0 }
 0x114   : > { %v402_v48 = vmax.f32 %v340_v47, 0.0  ;;  %v1289_v49 = vpop.f32.mrb[6].mxu0  ;;  %1429 = vmatpush3.bf16.msra.mxu1 %v1426_v21 }
 0x115   : > { %v355_v51 = vadd.f32 %v1289_v49, %v1118_v31  ;;  %v349_v52 = vpop.f32.mrb[7].mxu0  ;;  %1431 = vmatprep.subr.bf16.mxu1 %v1430_v24 }
 0x116   : > { %v350_v53 = vadd.f32 %v1118_v31, %v349_v52  ;;  %1316 = vmatprep.mubr.msk.f32.mxu1 %vm204_vm0, %v402_v48 }
 0x117   : > { %1317 = vmatmul.mubr.msk.f32.gmra.mrb[4].mxu1 %vm204_vm0, %v403_v50  ;;  %v405_v56 = vmax.f32 %v355_v51, 0.0 }
 0x118   : > { %v404_v54 = vmax.f32 %v350_v53, 0.0  ;;  %v1292_v55 = vpop.f32.mrb[8].mxu0  ;;  %1433 = vmatpush3.bf16.msra.mxu1 %v1430_v24 }
 0x119   : > { %v365_v57 = vadd.f32 %v1292_v55, %v1118_v31  ;;  %v359_v58 = vpop.f32.mrb[9].mxu0  ;;  %1435 = vmatprep.subr.bf16.mxu1 %v1434_v27 }
 0x11a   : > { %v360_v59 = vadd.f32 %v1118_v31, %v359_v58  ;;  %1319 = vmatprep.mubr.msk.f32.mxu1 %vm204_vm0, %v404_v54 }
 0x11b   : > { %1320 = vmatmul.mubr.msk.f32.gmra.mrb[6].mxu1 %vm204_vm0, %v405_v56  ;;  %v407_v62 = vmax.f32 %v365_v57, 0.0 }
 0x11c   : > { %v406_v60 = vmax.f32 %v360_v59, 0.0  ;;  %v1295_v61 = vpop.f32.mrb[10].mxu0  ;;  %1437 = vmatpush3.bf16.msra.mxu1 %v1434_v27 }
 0x11d   : > { %v375_v63 = vadd.f32 %v1295_v61, %v1118_v31  ;;  %v369_v0 = vpop.f32.mrb[11].mxu0  ;;  %v1152_v61 = vld [vmem:[#allocation2 + $0x210] ss:$0 sm:$0xff] }
 0x11e   : > { %v370_v1 = vadd.f32 %v1118_v31, %v369_v0  ;;  %1322 = vmatprep.mubr.msk.f32.mxu1 %vm204_vm0, %v406_v60 }
 0x11f   : > { %1323 = vmatmul.mubr.msk.f32.gmra.mrb[8].mxu1 %vm204_vm0, %v407_v62  ;;  %v409_v4 = vmax.f32 %v375_v63, 0.0 }
 0x120   : > { %v408_v2 = vmax.f32 %v370_v1, 0.0  ;;  %v1298_v3 = vpop.f32.mrb[12].mxu0 }
 0x121   : > { %v385_v5 = vadd.f32 %v1298_v3, %v1118_v31  ;;  %v379_v6 = vpop.f32.mrb[13].mxu0 }
 0x122   : > { %v380_v7 = vadd.f32 %v1118_v31, %v379_v6  ;;  %1325 = vmatprep.mubr.msk.f32.mxu1 %vm204_vm0, %v408_v2 }
 0x123   : > { %1326 = vmatmul.mubr.msk.f32.gmra.mrb[10].mxu1 %vm204_vm0, %v409_v4  ;;  %v411_v10 = vmax.f32 %v385_v5, 0.0 }
 0x124   : > { %v410_v8 = vmax.f32 %v380_v7, 0.0  ;;  %v1301_v9 = vpop.f32.mrb[14].mxu0 }
 0x125   : > { %v395_v11 = vadd.f32 %v1301_v9, %v1118_v31  ;;  %v389_v12 = vpop.f32.mrb[15].mxu0 }
 0x126   : > { %v390_v13 = vadd.f32 %v1118_v31, %v389_v12  ;;  %1328 = vmatprep.mubr.msk.f32.mxu1 %vm204_vm0, %v410_v8 }
 0x127   : > { %1329 = vmatmul.mubr.msk.f32.gmra.mrb[12].mxu1 %vm204_vm0, %v411_v10  ;;  %v413_v15 = vmax.f32 %v395_v11, 0.0 }
 0x128   : > { %v412_v14 = vmax.f32 %v390_v13, 0.0 }
 0x12a   : > { %1331 = vmatprep.mubr.msk.f32.mxu1 %vm204_vm0, %v412_v14 }
 0x12b   : > { %1332 = vmatmul.mubr.msk.f32.gmra.mrb[14].mxu1 %vm204_vm0, %v413_v15 }
 0x1e2   : > { %v1312_v29 = vpop.f32.mrb[0].mxu1 }
 0x1e3   : > { %v532_v30 = vpop.f32.mrb[1].mxu1  ;;  %v538_v32 = vadd.f32 %v1312_v29, %v1135_v28 }
 0x1e4   : > { %v533_v31 = vadd.f32 %v1135_v28, %v532_v30 }
 0x1e6   : > { %v1315_v33 = vpop.f32.mrb[2].mxu1  ;;  %1338 = vmatprep.mubr.msk.f32.mxu0 %vm615_vm1, %v533_v31 }
 0x1e7   : > { %v542_v34 = vpop.f32.mrb[3].mxu1  ;;  %1339 = vmatmul.mubr.msk.f32.vlgmr.msra.gmra.mrb[16].mxu0 %vm615_vm1, %v538_v32  ;;  %v548_v36 = vadd.f32 %v1315_v33, %v1135_v28 }
 0x1e8   : > { %v543_v35 = vadd.f32 %v1135_v28, %v542_v34 }
 0x1ea   : > { %v1318_v37 = vpop.f32.mrb[4].mxu1  ;;  %1341 = vmatprep.mubr.msk.f32.mxu0 %vm615_vm1, %v543_v35 }
 0x1eb   : > { %v552_v38 = vpop.f32.mrb[5].mxu1  ;;  %1342 = vmatmul.mubr.msk.f32.gmra.mrb[18].mxu0 %vm615_vm1, %v548_v36  ;;  %v558_v40 = vadd.f32 %v1318_v37, %v1135_v28 }
 0x1ec   : > { %v553_v39 = vadd.f32 %v1135_v28, %v552_v38 }
 0x1ee   : > { %v1321_v41 = vpop.f32.mrb[6].mxu1  ;;  %1344 = vmatprep.mubr.msk.f32.mxu0 %vm615_vm1, %v553_v39 }
 0x1ef   : > { %v562_v42 = vpop.f32.mrb[7].mxu1  ;;  %1345 = vmatmul.mubr.msk.f32.gmra.mrb[20].mxu0 %vm615_vm1, %v558_v40  ;;  %v568_v44 = vadd.f32 %v1321_v41, %v1135_v28 }
 0x1f0   : > { %v563_v43 = vadd.f32 %v1135_v28, %v562_v42 }
 0x1f2   : > { %v1324_v45 = vpop.f32.mrb[8].mxu1  ;;  %1347 = vmatprep.mubr.msk.f32.mxu0 %vm615_vm1, %v563_v43 }
 0x1f3   : > { %v572_v46 = vpop.f32.mrb[9].mxu1  ;;  %1348 = vmatmul.mubr.msk.f32.gmra.mrb[22].mxu0 %vm615_vm1, %v568_v44  ;;  %v578_v48 = vadd.f32 %v1324_v45, %v1135_v28 }
 0x1f4   : > { %v573_v47 = vadd.f32 %v1135_v28, %v572_v46  ;;  %v1169_v46 = vld [vmem:[#allocation2 + $0x218] ss:$0 sm:$0xff] }
 0x1f6   : > { %v1327_v49 = vpop.f32.mrb[10].mxu1  ;;  %1350 = vmatprep.mubr.msk.f32.mxu0 %vm615_vm1, %v573_v47 }
 0x1f7   : > { %v582_v50 = vpop.f32.mrb[11].mxu1  ;;  %1351 = vmatmul.mubr.msk.f32.gmra.mrb[24].mxu0 %vm615_vm1, %v578_v48  ;;  %v588_v52 = vadd.f32 %v1327_v49, %v1135_v28 }
 0x1f8   : > { %v583_v51 = vadd.f32 %v1135_v28, %v582_v50 }
 0x1fa   : > { %v1330_v53 = vpop.f32.mrb[12].mxu1  ;;  %1353 = vmatprep.mubr.msk.f32.mxu0 %vm615_vm1, %v583_v51 }
 0x1fb   : > { %v592_v54 = vpop.f32.mrb[13].mxu1  ;;  %1354 = vmatmul.mubr.msk.f32.gmra.mrb[26].mxu0 %vm615_vm1, %v588_v52  ;;  %v598_v56 = vadd.f32 %v1330_v53, %v1135_v28 }
 0x1fc   : > { %v593_v55 = vadd.f32 %v1135_v28, %v592_v54 }
 0x1fe   : > { %v1333_v57 = vpop.f32.mrb[14].mxu1  ;;  %1356 = vmatprep.mubr.msk.f32.mxu0 %vm615_vm1, %v593_v55 }
 0x1ff   : > { %v602_v58 = vpop.f32.mrb[15].mxu1  ;;  %1357 = vmatmul.mubr.msk.f32.gmra.mrb[28].mxu0 %vm615_vm1, %v598_v56  ;;  %v608_v60 = vadd.f32 %v1333_v57, %v1135_v28 }
 0x200   : > { %v603_v59 = vadd.f32 %v1135_v28, %v602_v58 }
 0x202   : > { %1359 = vmatprep.mubr.msk.f32.mxu0 %vm615_vm1, %v603_v59 }
 0x203   : > { %1360 = vmatmul.mubr.msk.f32.gmra.mrb[30].mxu0 %vm615_vm1, %v608_v60 }
 0x2ba   : > { %v1340_v62 = vpop.f32.mrb[16].mxu0 }
 0x2bb   : > { %v736_v63 = vadd.f32 %v1340_v62, %v1152_v61  ;;  %v730_v0 = vpop.f32.mrb[17].mxu0 }
 0x2bc   : > { %v731_v1 = vadd.f32 %v1152_v61, %v730_v0 }
 0x2bd   : > { %v810_v4 = vmax.f32 %v736_v63, 0.0 }
 0x2be   : > { %v809_v2 = vmax.f32 %v731_v1, 0.0  ;;  %v1343_v3 = vpop.f32.mrb[18].mxu0 }
 0x2bf   : > { %v746_v5 = vadd.f32 %v1343_v3, %v1152_v61  ;;  %v740_v6 = vpop.f32.mrb[19].mxu0 }
 0x2c0   : > { %v741_v7 = vadd.f32 %v1152_v61, %v740_v6  ;;  %1378 = vmatprep.mubr.msk.f32.mxu1 %vm829_vm2, %v809_v2 }
 0x2c1   : > { %1379 = vmatmul.mubr.msk.f32.vlgmr.msra.gmra.mrb[16].mxu1 %vm829_vm2, %v810_v4  ;;  %v812_v10 = vmax.f32 %v746_v5, 0.0 }
 0x2c2   : > { %v811_v8 = vmax.f32 %v741_v7, 0.0  ;;  %v1346_v9 = vpop.f32.mrb[20].mxu0 }
 0x2c3   : > { %v756_v11 = vadd.f32 %v1346_v9, %v1152_v61  ;;  %v750_v12 = vpop.f32.mrb[21].mxu0 }
 0x2c4   : > { %v751_v13 = vadd.f32 %v1152_v61, %v750_v12  ;;  %1381 = vmatprep.mubr.msk.f32.mxu1 %vm829_vm2, %v811_v8 }
 0x2c5   : > { %1382 = vmatmul.mubr.msk.f32.gmra.mrb[18].mxu1 %vm829_vm2, %v812_v10  ;;  %v814_v16 = vmax.f32 %v756_v11, 0.0 }
 0x2c6   : > { %v813_v14 = vmax.f32 %v751_v13, 0.0  ;;  %v1349_v15 = vpop.f32.mrb[22].mxu0 }
 0x2c7   : > { %v766_v17 = vadd.f32 %v1349_v15, %v1152_v61  ;;  %v760_v18 = vpop.f32.mrb[23].mxu0 }
 0x2c8   : > { %v761_v19 = vadd.f32 %v1152_v61, %v760_v18  ;;  %1384 = vmatprep.mubr.msk.f32.mxu1 %vm829_vm2, %v813_v14 }
 0x2c9   : > { %1385 = vmatmul.mubr.msk.f32.gmra.mrb[20].mxu1 %vm829_vm2, %v814_v16  ;;  %v816_v22 = vmax.f32 %v766_v17, 0.0 }
 0x2ca   : > { %v815_v20 = vmax.f32 %v761_v19, 0.0  ;;  %v1352_v21 = vpop.f32.mrb[24].mxu0 }
 0x2cb   : > { %v776_v23 = vadd.f32 %v1352_v21, %v1152_v61  ;;  %v770_v24 = vpop.f32.mrb[25].mxu0 }
 0x2cc   : > { %v771_v25 = vadd.f32 %v1152_v61, %v770_v24  ;;  %1387 = vmatprep.mubr.msk.f32.mxu1 %vm829_vm2, %v815_v20 }
 0x2cd   : > { %1388 = vmatmul.mubr.msk.f32.gmra.mrb[22].mxu1 %vm829_vm2, %v816_v22  ;;  %v818_v28 = vmax.f32 %v776_v23, 0.0 }
 0x2ce   : > { %v817_v26 = vmax.f32 %v771_v25, 0.0  ;;  %v1355_v27 = vpop.f32.mrb[26].mxu0 }
 0x2cf   : > { %v786_v29 = vadd.f32 %v1355_v27, %v1152_v61  ;;  %v780_v30 = vpop.f32.mrb[27].mxu0 }
 0x2d0   : > { %v781_v31 = vadd.f32 %v1152_v61, %v780_v30  ;;  %1390 = vmatprep.mubr.msk.f32.mxu1 %vm829_vm2, %v817_v26 }
 0x2d1   : > { %1391 = vmatmul.mubr.msk.f32.gmra.mrb[24].mxu1 %vm829_vm2, %v818_v28  ;;  %v820_v34 = vmax.f32 %v786_v29, 0.0 }
 0x2d2   : > { %v819_v32 = vmax.f32 %v781_v31, 0.0  ;;  %v1358_v33 = vpop.f32.mrb[28].mxu0 }
 0x2d3   : > { %v796_v35 = vadd.f32 %v1358_v33, %v1152_v61  ;;  %v790_v36 = vpop.f32.mrb[29].mxu0 }
 0x2d4   : > { %v791_v37 = vadd.f32 %v1152_v61, %v790_v36  ;;  %1393 = vmatprep.mubr.msk.f32.mxu1 %vm829_vm2, %v819_v32 }
 0x2d5   : > { %1394 = vmatmul.mubr.msk.f32.gmra.mrb[26].mxu1 %vm829_vm2, %v820_v34  ;;  %v822_v40 = vmax.f32 %v796_v35, 0.0 }
 0x2d6   : > { %v821_v38 = vmax.f32 %v791_v37, 0.0  ;;  %v1361_v39 = vpop.f32.mrb[30].mxu0 }
 0x2d7   : > { %v806_v41 = vadd.f32 %v1361_v39, %v1152_v61  ;;  %v800_v42 = vpop.f32.mrb[31].mxu0 }
 0x2d8   : > { %v801_v43 = vadd.f32 %v1152_v61, %v800_v42  ;;  %1396 = vmatprep.mubr.msk.f32.mxu1 %vm829_vm2, %v821_v38 }
 0x2d9   : > { %1397 = vmatmul.mubr.msk.f32.gmra.mrb[28].mxu1 %vm829_vm2, %v822_v40  ;;  %v824_v45 = vmax.f32 %v806_v41, 0.0 }
 0x2da   : > { %v823_v44 = vmax.f32 %v801_v43, 0.0 }
 0x2dc   : > { %1399 = vmatprep.mubr.msk.f32.mxu1 %vm829_vm2, %v823_v44 }
 0x2dd   : > { %1400 = vmatmul.mubr.msk.f32.gmra.mrb[30].mxu1 %vm829_vm2, %v824_v45 }
 0x394   : > { %v1380_v47 = vpop.f32.mrb[16].mxu1 }
 0x395   : > { %v950_v48 = vadd.f32 %v1380_v47, %v1169_v46  ;;  %v944_v49 = vpop.f32.mrb[17].mxu1 }
 0x396   : > { %v945_v50 = vadd.f32 %v1169_v46, %v944_v49 }
 0x397   : > { %1024 = vst [vmem:[%s1662_s7 + $0x8] sm:$0xff] %v950_v48 }
 0x398   : > { %1023 = vst [vmem:[%s1662_s7] sm:$0xff] %v945_v50  ;;  %v1383_v51 = vpop.f32.mrb[18].mxu1 }
 0x399   : > { %v960_v52 = vadd.f32 %v1383_v51, %v1169_v46  ;;  %v954_v53 = vpop.f32.mrb[19].mxu1 }
 0x39a   : > { %v955_v54 = vadd.f32 %v1169_v46, %v954_v53 }
 0x39b   : > { %1026 = vst [vmem:[%s1662_s7 + $0x18] sm:$0xff] %v960_v52 }
 0x39c   : > { %1025 = vst [vmem:[%s1662_s7 + $0x10] sm:$0xff] %v955_v54  ;;  %v1386_v55 = vpop.f32.mrb[20].mxu1 }
 0x39d   : > { %v970_v56 = vadd.f32 %v1386_v55, %v1169_v46  ;;  %v964_v57 = vpop.f32.mrb[21].mxu1 }
 0x39e   : > { %v965_v58 = vadd.f32 %v1169_v46, %v964_v57 }
 0x39f   : > { %1028 = vst [vmem:[%s1662_s7 + $0x28] sm:$0xff] %v970_v56 }
 0x3a0   : > { %1027 = vst [vmem:[%s1662_s7 + $0x20] sm:$0xff] %v965_v58  ;;  %v1389_v59 = vpop.f32.mrb[22].mxu1 }
 0x3a1   : > { %v980_v60 = vadd.f32 %v1389_v59, %v1169_v46  ;;  %v974_v61 = vpop.f32.mrb[23].mxu1 }
 0x3a2   : > { %v975_v62 = vadd.f32 %v1169_v46, %v974_v61 }
 0x3a3   : > { %1030 = vst [vmem:[%s1662_s7 + $0x38] sm:$0xff] %v980_v60 }
 0x3a4   : > { %1029 = vst [vmem:[%s1662_s7 + $0x30] sm:$0xff] %v975_v62  ;;  %v1392_v63 = vpop.f32.mrb[24].mxu1 }
 0x3a5   : > { %v990_v0 = vadd.f32 %v1392_v63, %v1169_v46  ;;  %v984_v1 = vpop.f32.mrb[25].mxu1 }
 0x3a6   : > { %v985_v2 = vadd.f32 %v1169_v46, %v984_v1 }
 0x3a7   : > { %1032 = vst [vmem:[%s1662_s7 + $0x48] sm:$0xff] %v990_v0 }
 0x3a8   : > { %1031 = vst [vmem:[%s1662_s7 + $0x40] sm:$0xff] %v985_v2  ;;  %v1395_v3 = vpop.f32.mrb[26].mxu1 }
 0x3a9   : > { %v1000_v4 = vadd.f32 %v1395_v3, %v1169_v46  ;;  %v994_v5 = vpop.f32.mrb[27].mxu1 }
 0x3aa   : > { %v995_v6 = vadd.f32 %v1169_v46, %v994_v5 }
 0x3ab   : > { %1034 = vst [vmem:[%s1662_s7 + $0x58] sm:$0xff] %v1000_v4 }
 0x3ac   : > { %1033 = vst [vmem:[%s1662_s7 + $0x50] sm:$0xff] %v995_v6  ;;  %v1398_v7 = vpop.f32.mrb[28].mxu1 }
 0x3ad   : > { %v1010_v8 = vadd.f32 %v1398_v7, %v1169_v46  ;;  %v1004_v9 = vpop.f32.mrb[29].mxu1 }
 0x3ae   : > { %v1005_v10 = vadd.f32 %v1169_v46, %v1004_v9 }
 0x3af   : > { %1036 = vst [vmem:[%s1662_s7 + $0x68] sm:$0xff] %v1010_v8 }
 0x3b0   : > { %1035 = vst [vmem:[%s1662_s7 + $0x60] sm:$0xff] %v1005_v10  ;;  %v1401_v11 = vpop.f32.mrb[30].mxu1 }
 0x3b1   : > { %v1020_v12 = vadd.f32 %v1401_v11, %v1169_v46  ;;  %v1014_v13 = vpop.f32.mrb[31].mxu1 }
 0x3b2   : > { %v1015_v14 = vadd.f32 %v1169_v46, %v1014_v13 }
 0x3b3   : > { %1038 = vst [vmem:[%s1662_s7 + $0x78] sm:$0xff] %v1020_v12 }
 0x3b4   : > { %1037 = vst [vmem:[%s1662_s7 + $0x70] sm:$0xff] %v1015_v14 }
 0x3b5 PF: > { %s13_s9 = sadd.s32 1, %s1497_s9  }
 0x3b6   : > { %p10_p3 = scmp.ge.s32.totalorder %s13_s9, 4  }
 0x3b8   :  { %12 = sbr.rel (!%p10_p3) target bundleno = 1 (0x1), region = 63 }
 0x3bf   :  { %1061 = vsyncpa [#allocation3], 1 }
 0x3c0   :  { %1063 = vsyncpa [#allocation3 + $0x1], 1 }

</bundles_post_ra>
